<compile_context>
chip_gen: v7x
topology: tpu7x:2x2x1
jax: 0.10.0
libtpu: 0.0.40
codegen_flags: <defaults>
</compile_context>

<pallas_src>
import functools

import jax
import jax.numpy as jnp
from jax import lax
from jax.experimental import pallas as pl
from jax.experimental.pallas import tpu as pltpu

_LANE = 128               # lane tile (last dim)
_SUB = 8                  # sublanes per f32 vreg
_BLK_BYTES = 4 << 20      # target bytes per input block per pipeline buffer
_VMEM_LIMIT = 48 << 20    # fits v7x's 64 MiB physical VMEM; plenty on v5e/v6e


def _num_tensorcores():
    """2 on v7x-class chips (2 TCs / chip), else 1 (v5e/v6e)."""
    try:
        kind = jax.devices()[0].device_kind.lower()
    except Exception:
        return 1
    return 2 if "v7" in kind else 1


def _combi_partials_kernel(p_ref, l_ref, sq_ref, ab_ref, *,
                           blocks_per_core, blk_rows, n_rows, needs_mask):
    c = pl.program_id(0)   # core / partial-sum index
    i = pl.program_id(1)   # streaming block index ("arbitrary" reduction axis)

    @pl.when(i == 0)
    def _init():
        sq_ref[...] = jnp.zeros_like(sq_ref)
        ab_ref[...] = jnp.zeros_like(ab_ref)

    d = p_ref[...].astype(jnp.float32) - l_ref[...].astype(jnp.float32)

    def _accum(dv):
        # (blk_rows,128) -> (blk_rows//8, 8, 128): summing axis 0 is whole-vreg
        # VALU adds for f32 (no XLU sublane reduce). The final 8->1 sublane and
        # cross-lane reduce is deferred to the tiny JAX epilogue.
        sq_ref[...] += jnp.sum((dv * dv).reshape(-1, _SUB, _LANE),
                               axis=0, keepdims=True)
        ab_ref[...] += jnp.sum(jnp.abs(dv).reshape(-1, _SUB, _LANE),
                               axis=0, keepdims=True)

    if needs_mask:
        # Only the block containing row n_rows (and any clamped duplicate
        # blocks, whose logical row0 >= n_rows) pays for the mask; all full
        # blocks take the unmasked path.
        row0 = (c * blocks_per_core + i) * blk_rows
        is_tail = row0 + blk_rows > n_rows

        @pl.when(jnp.logical_not(is_tail))
        def _full():
            _accum(d)

        @pl.when(is_tail)
        def _masked():
            local = lax.broadcasted_iota(jnp.int32, d.shape, 0)
            # Mask BEFORE square/abs so garbage (even NaN/Inf) contributes 0.
            _accum(jnp.where(row0 + local < n_rows, d, 0.0))
    else:
        _accum(d)


def combi_loss(predictions, labels, inputs=None, *, alpha=1.0):
    """alpha * MSELoss(pred, lab) + (1 - alpha) * L1Loss(pred, lab), mean-reduced."""
    del inputs  # only used by the EnergyLoss secondary-loss branch (not implemented)
    assert predictions.shape == labels.shape
    n_total = 1
    for s in predictions.shape:
        n_total *= int(s)

    flat_p = predictions.reshape(-1)
    flat_l = labels.reshape(-1)

    # Kernel streams the (8*128)-aligned prefix; the <1024-element remainder is
    # handled in plain JAX (no full-tensor jnp.pad copies).
    n_main = (n_total // (_SUB * _LANE)) * (_SUB * _LANE)
    rows = n_main // _LANE              # multiple of 8 by construction

    sse = jnp.float32(0.0)
    sae = jnp.float32(0.0)

    if rows > 0:
        p2 = flat_p[:n_main].reshape(rows, _LANE)
        l2 = flat_l[:n_main].reshape(rows, _LANE)

        # 4 MiB of input per block per buffer; bf16 inputs get 2x the rows for
        # the same byte budget (kernel upcasts to f32 in-register).
        itemsize = int(jnp.dtype(predictions.dtype).itemsize)
        cap = max(_SUB, (_BLK_BYTES // (_LANE * itemsize)) // 16 * 16)

        if rows <= cap:
            blk_rows, n_blocks = rows, 1       # full extent (always legal)
        else:
            blk_rows, n_blocks = cap, pl.cdiv(rows, cap)

        ncores = 2 if (_num_tensorcores() == 2 and n_blocks >= 8) else 1
        bpc = pl.cdiv(n_blocks, ncores)        # blocks per core
        needs_mask = (ncores * bpc * blk_rows) != rows

        if ncores * bpc == n_blocks:
            def in_map(c, i):
                return (c * bpc + i, 0)
        else:
            # Clamp overflow iterations onto the last real block; the in-kernel
            # mask (keyed off the *logical* block id) zeroes their contribution.
            def in_map(c, i):
                return (jnp.minimum(c * bpc + i, n_blocks - 1), 0)

        if ncores == 2:
            # Guarantee the row range is split across both TensorCores (v7x).
            dims = (pltpu.CORE_PARALLEL, pltpu.ARBITRARY)
        else:
            dims = (pltpu.ARBITRARY, pltpu.ARBITRARY)

        kernel = functools.partial(
            _combi_partials_kernel,
            blocks_per_core=bpc,
            blk_rows=blk_rows,
            n_rows=rows,
            needs_mask=needs_mask,
        )

        out_sq, out_ab = pl.pallas_call(
            kernel,
            out_shape=(
                jax.ShapeDtypeStruct((ncores, _SUB, _LANE), jnp.float32),
                jax.ShapeDtypeStruct((ncores, _SUB, _LANE), jnp.float32),
            ),
            grid=(ncores, bpc),
            in_specs=[
                pl.BlockSpec((blk_rows, _LANE), in_map),
                pl.BlockSpec((blk_rows, _LANE), in_map),
            ],
            out_specs=(
                pl.BlockSpec((1, _SUB, _LANE), lambda c, i: (c, 0, 0)),
                pl.BlockSpec((1, _SUB, _LANE), lambda c, i: (c, 0, 0)),
            ),
            compiler_params=pltpu.CompilerParams(
                dimension_semantics=dims,
                vmem_limit_bytes=_VMEM_LIMIT,
            ),
        )(p2, l2)

        sse = sse + jnp.sum(out_sq)   # tiny cross-lane / cross-core reduce
        sae = sae + jnp.sum(out_ab)

    if n_main != n_total:
        # <1024-element remainder, negligible in plain JAX.
        tp = flat_p[n_main:].astype(jnp.float32)
        tl = flat_l[n_main:].astype(jnp.float32)
        td = tp - tl
        sse = sse + jnp.sum(td * td)
        sae = sae + jnp.sum(jnp.abs(td))

    inv_n = 1.0 / float(n_total)
    return (alpha * sse + (1.0 - alpha) * sae) * inv_n


if __name__ == "__main__":
    key = jax.random.PRNGKey(0)
    kp, kl = jax.random.split(key)

    # NCHW, matching the PyTorch conv/data convention of the surrounding code.
    predictions = jax.random.normal(kp, (2, 4, 16, 16), dtype=jnp.float32)
    labels = jax.random.normal(kl, (2, 4, 16, 16), dtype=jnp.float32)

    alpha = 0.5  # exercise both MSE and L1 terms
    loss_fn = jax.jit(functools.partial(combi_loss, alpha=alpha))
    loss = jax.block_until_ready(loss_fn(predictions, labels))

    # plain-JAX reference check
    d = predictions - labels
    ref = alpha * jnp.mean(d * d) + (1.0 - alpha) * jnp.mean(jnp.abs(d))
    assert jnp.allclose(loss, ref, rtol=1e-5, atol=1e-6), (loss, ref)

    # also exercise the unaligned-remainder path (numel % 1024 != 0)
    kp2, kl2 = jax.random.split(kl)
    p_odd = jax.random.normal(kp2, (2, 3, 17, 17), dtype=jnp.float32)
    l_odd = jax.random.normal(kl2, (2, 3, 17, 17), dtype=jnp.float32)
    loss_odd = jax.block_until_ready(
        jax.jit(functools.partial(combi_loss, alpha=alpha))(p_odd, l_odd))
    d_odd = p_odd - l_odd
    ref_odd = alpha * jnp.mean(d_odd * d_odd) + (1.0 - alpha) * jnp.mean(jnp.abs(d_odd))
    assert jnp.allclose(loss_odd, ref_odd, rtol=1e-5, atol=1e-6), (loss_odd, ref_odd)

    print("KERNEL_OK")
</pallas_src>

<mosaic_0001>
module attributes {stable_mosaic.version = 11 : i64} {
  func.func @_combi_partials_kernel(%arg0: i32, %arg1: i32, %arg2: memref<16x128xf32, #tpu.memory_space<vmem>>, %arg3: memref<16x128xf32, #tpu.memory_space<vmem>>, %arg4: memref<1x8x128xf32, #tpu.memory_space<vmem>>, %arg5: memref<1x8x128xf32, #tpu.memory_space<vmem>>) attributes {dimension_semantics = [#tpu.dimension_semantics<arbitrary>, #tpu.dimension_semantics<arbitrary>], iteration_bounds = array<i64: 1, 1>, scalar_prefetch = 0 : i64, scratch_operands = 0 : i64, tpu.core_type = #tpu.core_type<tc>, window_params = [{transform_indices = @transform_0, window_bounds = array<i64: 16, 128>}, {transform_indices = @transform_1, window_bounds = array<i64: 16, 128>}, {transform_indices = @transform_2, window_bounds = array<i64: 1, 8, 128>}, {transform_indices = @transform_3, window_bounds = array<i64: 1, 8, 128>}]} {
    %c0_i32 = arith.constant 0 : i32
    %0 = arith.cmpi eq, %arg1, %c0_i32 : i32
    %1 = arith.extui %0 : i1 to i32
    %c0_i32_0 = arith.constant 0 : i32
    %2 = arith.cmpi ne, %1, %c0_i32_0 : i32
    scf.if %2 {
      %cst_17 = arith.constant 0.000000e+00 : f32
      %20 = vector.broadcast %cst_17 : f32 to vector<1x8x128xf32>
      %c0_18 = arith.constant 0 : index
      %c0_19 = arith.constant 0 : index
      %c0_20 = arith.constant 0 : index
      %21 = vector.load %arg4[%c0_18, %c0_19, %c0_20] : memref<1x8x128xf32, #tpu.memory_space<vmem>>, vector<1x8x128xf32>
      tpu.vector_store %arg4[%c0_18, %c0_19, %c0_20], %20 {strides = array<i32>} : memref<1x8x128xf32, #tpu.memory_space<vmem>>, vector<1x8x128xf32>,
      %cst_21 = arith.constant 0.000000e+00 : f32
      %22 = vector.broadcast %cst_21 : f32 to vector<1x8x128xf32>
      %c0_22 = arith.constant 0 : index
      %c0_23 = arith.constant 0 : index
      %c0_24 = arith.constant 0 : index
      %23 = vector.load %arg5[%c0_22, %c0_23, %c0_24] : memref<1x8x128xf32, #tpu.memory_space<vmem>>, vector<1x8x128xf32>
      tpu.vector_store %arg5[%c0_22, %c0_23, %c0_24], %22 {strides = array<i32>} : memref<1x8x128xf32, #tpu.memory_space<vmem>>, vector<1x8x128xf32>,
    } else {
    }
    %c0 = arith.constant 0 : index
    %c0_1 = arith.constant 0 : index
    %3 = vector.load %arg2[%c0, %c0_1] : memref<16x128xf32, #tpu.memory_space<vmem>>, vector<16x128xf32>
    %c0_2 = arith.constant 0 : index
    %c0_3 = arith.constant 0 : index
    %4 = vector.load %arg3[%c0_2, %c0_3] : memref<16x128xf32, #tpu.memory_space<vmem>>, vector<16x128xf32>
    %5 = arith.subf %3, %4 : vector<16x128xf32>
    %c0_4 = arith.constant 0 : index
    %c0_5 = arith.constant 0 : index
    %c0_6 = arith.constant 0 : index
    %6 = vector.load %arg4[%c0_4, %c0_5, %c0_6] : memref<1x8x128xf32, #tpu.memory_space<vmem>>, vector<1x8x128xf32>
    %7 = arith.mulf %5, %5 : vector<16x128xf32>
    %8 = vector.shape_cast %7 : vector<16x128xf32> to vector<2x8x128xf32>
    %cst = arith.constant dense<0.000000e+00> : vector<8x128xf32>
    %9 = vector.multi_reduction <add>, %8, %cst [0] : vector<2x8x128xf32> to vector<8x128xf32>
    %10 = vector.shape_cast %9 : vector<8x128xf32> to vector<1x8x128xf32>
    %11 = arith.addf %6, %10 : vector<1x8x128xf32>
    %c0_7 = arith.constant 0 : index
    %c0_8 = arith.constant 0 : index
    %c0_9 = arith.constant 0 : index
    %12 = vector.load %arg4[%c0_7, %c0_8, %c0_9] : memref<1x8x128xf32, #tpu.memory_space<vmem>>, vector<1x8x128xf32>
    tpu.vector_store %arg4[%c0_7, %c0_8, %c0_9], %11 {strides = array<i32>} : memref<1x8x128xf32, #tpu.memory_space<vmem>>, vector<1x8x128xf32>,
    %c0_10 = arith.constant 0 : index
    %c0_11 = arith.constant 0 : index
    %c0_12 = arith.constant 0 : index
    %13 = vector.load %arg5[%c0_10, %c0_11, %c0_12] : memref<1x8x128xf32, #tpu.memory_space<vmem>>, vector<1x8x128xf32>
    %14 = math.absf %5 : vector<16x128xf32>
    %15 = vector.shape_cast %14 : vector<16x128xf32> to vector<2x8x128xf32>
    %cst_13 = arith.constant dense<0.000000e+00> : vector<8x128xf32>
    %16 = vector.multi_reduction <add>, %15, %cst_13 [0] : vector<2x8x128xf32> to vector<8x128xf32>
    %17 = vector.shape_cast %16 : vector<8x128xf32> to vector<1x8x128xf32>
    %18 = arith.addf %13, %17 : vector<1x8x128xf32>
    %c0_14 = arith.constant 0 : index
    %c0_15 = arith.constant 0 : index
    %c0_16 = arith.constant 0 : index
    %19 = vector.load %arg5[%c0_14, %c0_15, %c0_16] : memref<1x8x128xf32, #tpu.memory_space<vmem>>, vector<1x8x128xf32>
    tpu.vector_store %arg5[%c0_14, %c0_15, %c0_16], %18 {strides = array<i32>} : memref<1x8x128xf32, #tpu.memory_space<vmem>>, vector<1x8x128xf32>,
    return
  }
  func.func @transform_0(%arg0: i32, %arg1: i32) -> (i32, i32) {
    %c1_i32 = arith.constant 1 : i32
    %0 = arith.muli %arg0, %c1_i32 : i32
    %1 = arith.addi %0, %arg1 : i32
    %c0_i32 = arith.constant 0 : i32
    %c0_i32_0 = arith.constant 0 : i32
    return %1, %c0_i32 : i32, i32
  }
  func.func @transform_1(%arg0: i32, %arg1: i32) -> (i32, i32) {
    %c1_i32 = arith.constant 1 : i32
    %0 = arith.muli %arg0, %c1_i32 : i32
    %1 = arith.addi %0, %arg1 : i32
    %c0_i32 = arith.constant 0 : i32
    %c0_i32_0 = arith.constant 0 : i32
    return %1, %c0_i32 : i32, i32
  }
  func.func @transform_2(%arg0: i32, %arg1: i32) -> (i32, i32, i32) {
    %c0_i32 = arith.constant 0 : i32
    %c0_i32_0 = arith.constant 0 : i32
    %c0_i32_1 = arith.constant 0 : i32
    return %arg0, %c0_i32, %c0_i32_0 : i32, i32, i32
  }
  func.func @transform_3(%arg0: i32, %arg1: i32) -> (i32, i32, i32) {
    %c0_i32 = arith.constant 0 : i32
    %c0_i32_0 = arith.constant 0 : i32
    %c0_i32_1 = arith.constant 0 : i32
    return %arg0, %c0_i32, %c0_i32_0 : i32, i32, i32
  }
}

</mosaic_0001>

<bundles_post_ra>
// kernel: combi_loss.1
= control target key start
LH: loop header
LB: loop body
LE: loop exit
PB: predicated region body
PF: predicated region fallthrough
CT: control target
= control target key end

     0   :  { %s140_s0 = inlined_call_operand.vmem [shape: f32[16,128], index: 0, kind: input, shape index: {}]   ;;  %s141_s1 = inlined_call_operand.vmem [shape: f32[16,128], index: 1, kind: input, shape index: {}]   ;;  %s142_s2 = inlined_call_operand.vmem [shape: f32[1,8,128], index: 2, kind: output, shape index: {0}]   ;;  %s143_s3 = inlined_call_operand.vmem [shape: f32[1,8,128], index: 3, kind: output, shape index: {1}]  }
   0x1   :  { %v63_v0 = vld [vmem:[%s140_s0] sm:$0xff]  ;;  %v64_v1 = vld [vmem:[%s140_s0 + $0x8] sm:$0xff] }
   0x2   :  { %v65_v2 = vld [vmem:[%s141_s1] sm:$0xff]  ;;  %v66_v3 = vld [vmem:[%s141_s1 + $0x8] sm:$0xff] }
   0x3   :  { %v67_v4 = vsub.f32 %v63_v0, %v65_v2  ;;  %v68_v5 = vsub.f32 %v64_v1, %v66_v3 }
   0x5   :  { %v70_v6 = vmul.f32 %v67_v4, %v67_v4  ;;  %v76_v7 = vand.u32 2147483647, %v67_v4  ;;  %v71_v8 = vmul.f32 %v68_v5, %v68_v5  ;;  %v77_v9 = vand.u32 2147483647, %v68_v5 }
   0x7   :  { %v72_v10 = vadd.f32 %v71_v8, %v70_v6  ;;  %v78_v11 = vadd.f32 %v77_v9, %v76_v7 }
   0x9   :  { %74 = vst [vmem:[%s142_s2] sm:$0xff] %v72_v10  ;;  %80 = vst [vmem:[%s143_s3] sm:$0xff] %v78_v11 }

</bundles_post_ra>
